<compile_context>
chip_gen: v7x
topology: tpu7x:2x2x1
jax: 0.10.0
libtpu: 0.0.40
codegen_flags: <defaults>
</compile_context>

<pallas_src>
import functools

import jax
import jax.numpy as jnp
import numpy as np
from jax.experimental import pallas as pl
from jax.experimental.pallas import tpu as pltpu

_VMEM = pl.BlockSpec(memory_space=pltpu.MemorySpace.VMEM)
_LANE = 128


def _pad_last(x, mult=_LANE):
    """Zero-pad the last (lane) dim up to a multiple of `mult`."""
    pad = (-x.shape[-1]) % mult
    if pad == 0:
        return x
    cfg = [(0, 0)] * (x.ndim - 1) + [(0, pad)]
    return jnp.pad(x, cfg)


# --------------------------------------------------------------------------------------
# Once-per-sequence precompute: attention "keys" enc @ Wa_enc + b_a  (hoisted out of the
# per-step kernel because it is invariant across decode steps).
# --------------------------------------------------------------------------------------
def _attn_keys_kernel(enc_ref, wae_ref, ba_ref, proj_ref):
    enc = enc_ref[...]                                   # [B, S, 2Eh]
    B, S, EH2 = enc.shape
    Dh = wae_ref.shape[-1]
    proj = jnp.dot(enc.reshape(B * S, EH2), wae_ref[...],
                   preferred_element_type=jnp.float32)   # [B*S, Dh]
    proj_ref[...] = proj.reshape(B, S, Dh) + ba_ref[...][None, :, :]


def precompute_attention_context(enc_outs, kp):
    """enc_outs: [S, B, 2Eh] (PyTorch layout). Returns (enc_b [B,S,2Eh], enc_proj [B,S,Dh])."""
    # One permute per source sentence (not per decode step).
    enc_b = jnp.transpose(enc_outs, (1, 0, 2)).astype(jnp.float32)
    B, S, _ = enc_b.shape
    Dh = kp["wae"].shape[-1]
    enc_proj = pl.pallas_call(
        _attn_keys_kernel,
        out_shape=jax.ShapeDtypeStruct((B, S, Dh), jnp.float32),
        in_specs=[_VMEM, _VMEM, _VMEM],
        out_specs=_VMEM,
    )(enc_b, kp["wae"], kp["ba"])
    return enc_b, enc_proj


# --------------------------------------------------------------------------------------
# Per-decode-step kernel (== Decoder.forward)
# --------------------------------------------------------------------------------------
def _decoder_step_kernel(trg_ref, hid_ref, enc_ref, encproj_ref, mask_ref,
                         va_ref, whid_ref, bh_ref, wi_ref, bgi_ref,
                         wout_ref, bout_ref,
                         out_ref, hid_out_ref, a_out_ref, *, approx):
    trg = trg_ref[...]                                   # [B, E]
    hid = hid_ref[...]                                   # [B, Dh]
    enc = enc_ref[...]                                   # [B, S, 2Eh]
    mask = mask_ref[...]                                 # [B, S]
    B, S, EH2 = enc.shape
    E = trg.shape[-1]
    Dh = hid.shape[-1]

    # ---- fused hidden-state projection: hid @ [Wa_hid | Whr | Whz | Whn] (1 MXU push) ----
    hall = jnp.dot(hid, whid_ref[...], preferred_element_type=jnp.float32) + bh_ref[...]
    hid_proj = hall[:, 0:Dh]                             # attention query projection
    gh_r = hall[:, Dh:2 * Dh]                            # Whr h
    gh_z = hall[:, 2 * Dh:3 * Dh]                        # Whz h
    gh_n = hall[:, 3 * Dh:4 * Dh]                        # Whn h + b_hn

    # ---- Bahdanau attention (encoder projection precomputed & hoisted) ----
    energy = jnp.tanh(encproj_ref[...] + hid_proj[:, None, :])           # [B, S, Dh]
    scores = jnp.sum(energy * va_ref[...][None, :, :], axis=-1)          # [B, S]
    scores = jnp.where(mask == 0.0, -1e10, scores)
    scores = scores - jnp.max(scores, axis=-1, keepdims=True)
    exp_s = jnp.exp(scores)
    inv = pl.reciprocal(jnp.sum(exp_s, axis=-1, keepdims=True), approx=approx)
    a = exp_s * inv                                                      # [B, S]

    # ---- weighted context (bmm) ----
    weighted = jnp.sum(a[:, :, None] * enc, axis=1)                      # [B, 2Eh]

    # ---- GRU single step: fused r/z/n gates, no lane-dim concatenation ----
    gi = (jnp.dot(trg, wi_ref[:E, :], preferred_element_type=jnp.float32)
          + jnp.dot(weighted, wi_ref[E:, :], preferred_element_type=jnp.float32)
          + bgi_ref[...])                                                # [B, 3Dh(pad)]
    r = jax.nn.sigmoid(gi[:, 0:Dh] + gh_r)
    z = jax.nn.sigmoid(gi[:, Dh:2 * Dh] + gh_z)
    n = jnp.tanh(gi[:, 2 * Dh:3 * Dh] + r * gh_n)
    h_new = (1.0 - z) * n + z * hid                                      # [B, Dh]

    # ---- output projection: split wout rows instead of concatenating (out, weighted, trg) ----
    logits = (jnp.dot(h_new, wout_ref[0:Dh, :], preferred_element_type=jnp.float32)
              + jnp.dot(weighted, wout_ref[Dh:Dh + EH2, :], preferred_element_type=jnp.float32)
              + jnp.dot(trg, wout_ref[Dh + EH2:, :], preferred_element_type=jnp.float32)
              + bout_ref[...])                                           # [B, Vpad] lane-dense
    out_ref[...] = logits
    hid_out_ref[...] = h_new
    a_out_ref[...] = a


def decoder_step(trg_tokens, hid, enc_b, enc_proj, mask, kp, *, approx=True):
    """One decode step. trg_tokens: [B] int32, hid: [B, Dh].  Returns (logits, hid', attn)."""
    # glue: embedding gather; dropout == identity in eval mode.
    trg_emb = jnp.take(kp["emb"], trg_tokens, axis=0).astype(jnp.float32)   # [B, E]
    hid32 = hid.astype(jnp.float32)
    B, S, _ = enc_b.shape
    Dh = hid32.shape[-1]
    V = kp["vocab"]
    Vp = kp["wout"].shape[-1]

    kernel = functools.partial(_decoder_step_kernel, approx=approx)
    out_p, hid_new, a = pl.pallas_call(
        kernel,
        out_shape=(jax.ShapeDtypeStruct((B, Vp), jnp.float32),
                   jax.ShapeDtypeStruct((B, Dh), jnp.float32),
                   jax.ShapeDtypeStruct((B, S), jnp.float32)),
        in_specs=[_VMEM] * 12,
        out_specs=(_VMEM, _VMEM, _VMEM),
    )(trg_emb, hid32, enc_b, enc_proj, mask.astype(jnp.float32),
      kp["va"], kp["whid"], kp["bh"], kp["wi"], kp["bgi"],
      kp["wout"], kp["bout"])
    # NOTE: when this step is jitted inside a generation loop, alias hid -> hid'
    # (input_output_aliases) and donate the carry; omitted here since the eager test
    # harness reuses `hid` after the call.
    return out_p[:, :V], hid_new, a


def decoder_forward(trg_tokens, hid, enc_outs, mask, kp, *, approx=True):
    """Single-call equivalent of Decoder.forward (precompute + one step)."""
    enc_b, enc_proj = precompute_attention_context(enc_outs, kp)
    return decoder_step(trg_tokens, hid, enc_b, enc_proj, mask, kp, approx=approx)


# --------------------------------------------------------------------------------------
# Parameter packing (done once per model, not per step)
# --------------------------------------------------------------------------------------
def pack_decoder_params(p):
    Dh = p["whr"].shape[0]
    V = p["wout"].shape[-1]
    # hid-side: attention projection + three GRU hidden gates fused into one matrix.
    whid = jnp.concatenate([p["wah"], p["whr"], p["whz"], p["whn"]], axis=1)     # [Dh, 4Dh]
    bh = jnp.concatenate([jnp.zeros((1, 3 * Dh), jnp.float32), p["bhn"]], axis=1)  # [1, 4Dh]
    # input-side: three GRU input gates fused; rows 0:E multiply trg, rows E: multiply weighted.
    wi = jnp.concatenate([p["wir"], p["wiz"], p["win"]], axis=1)                 # [gru_in, 3Dh]
    bgi = jnp.concatenate([p["br"], p["bz"], p["bin"]], axis=1)                  # [1, 3Dh]
    return {
        "emb": p["emb"].astype(jnp.float32),
        "wae": p["wae"], "ba": p["ba"], "va": p["va"],
        "whid": _pad_last(whid), "bh": _pad_last(bh),
        "wi": _pad_last(wi), "bgi": _pad_last(bgi),
        "wout": _pad_last(p["wout"]), "bout": _pad_last(p["bout"]),   # lane-dense logits
        "vocab": V,
    }


# --------------------------------------------------------------------------------------
# Pure-JAX reference mirroring the PyTorch forward pass (uses the raw, unfused params)
# --------------------------------------------------------------------------------------
def ref_forward(trg_tokens, hid, enc_outs, mask, p):
    trg = jnp.take(p["emb"], trg_tokens, axis=0)
    enc = jnp.transpose(enc_outs, (1, 0, 2))
    hid_proj = hid @ p["wah"]
    enc_proj = jnp.einsum("bse,ed->bsd", enc, p["wae"])
    energy = jnp.tanh(enc_proj + hid_proj[:, None, :] + p["ba"][None, :, :])
    scores = jnp.sum(energy * p["va"][None, :, :], axis=-1)
    scores = jnp.where(mask == 0.0, -1e10, scores)
    a = jax.nn.softmax(scores, axis=-1)
    weighted = jnp.einsum("bs,bse->be", a, enc)
    x = jnp.concatenate([trg, weighted], -1)
    r = jax.nn.sigmoid(x @ p["wir"] + hid @ p["whr"] + p["br"])
    z = jax.nn.sigmoid(x @ p["wiz"] + hid @ p["whz"] + p["bz"])
    n = jnp.tanh(x @ p["win"] + p["bin"] + r * (hid @ p["whn"] + p["bhn"]))
    h_new = (1.0 - z) * n + z * hid
    out = jnp.concatenate([h_new, weighted, trg], -1) @ p["wout"] + p["bout"]
    return out, h_new, a


def make_params(key, V, E, Eh, Dh):
    """Deterministic synthetic parameters (shapes follow the PyTorch __init__)."""
    EH2 = 2 * Eh
    gru_in = E + EH2
    lin_in = E + EH2 + Dh
    keys = jax.random.split(key, 20)
    k = iter(keys)

    def rnd(kk, shape):
        return jax.random.normal(kk, shape, dtype=jnp.float32) * 0.1

    return {
        "emb": rnd(next(k), (V, E)),
        # attention: Linear(2Eh+Dh -> Dh), cat order is (hid, enc); stored transposed & split
        "wah": rnd(next(k), (Dh, Dh)),
        "wae": rnd(next(k), (EH2, Dh)),
        "ba": rnd(next(k), (1, Dh)),
        "va": rnd(next(k), (1, Dh)),            # Linear(Dh -> 1, bias=False)
        # GRU weights (weight_ih_l0 [3Dh, gru_in], weight_hh_l0 [3Dh, Dh]), split r/z/n, transposed
        "wir": rnd(next(k), (gru_in, Dh)),
        "wiz": rnd(next(k), (gru_in, Dh)),
        "win": rnd(next(k), (gru_in, Dh)),
        "whr": rnd(next(k), (Dh, Dh)),
        "whz": rnd(next(k), (Dh, Dh)),
        "whn": rnd(next(k), (Dh, Dh)),
        "br": rnd(next(k), (1, Dh)),            # b_ir + b_hr combined
        "bz": rnd(next(k), (1, Dh)),            # b_iz + b_hz combined
        "bin": rnd(next(k), (1, Dh)),
        "bhn": rnd(next(k), (1, Dh)),
        # output Linear(lin_in -> V), transposed
        "wout": rnd(next(k), (lin_in, V)),
        "bout": rnd(next(k), (1, V)),
    }


if __name__ == "__main__":
    B, S = 2, 8            # batch, source sequence length
    V = 64                 # trg_vocab
    E = 32                 # dec_emb_dim
    Eh = 16                # enc_hid_dim (bidirectional encoder -> 2*Eh features)
    Dh = 32                # dec_hid_dim

    key = jax.random.PRNGKey(0)
    kparam, k1, k2, k3 = jax.random.split(key, 4)
    params = make_params(kparam, V, E, Eh, Dh)

    trg_tokens = jax.random.randint(k1, (B,), 0, V, dtype=jnp.int32)      # current target tokens
    hid = jax.random.normal(k2, (B, Dh), dtype=jnp.float32)               # previous decoder hidden
    enc_outs = jax.random.normal(k3, (S, B, 2 * Eh), dtype=jnp.float32)   # encoder outputs [S, B, 2Eh]
    mask = jnp.ones((B, S), dtype=jnp.float32).at[1, S - 2:].set(0.0)     # mask a couple of positions

    # Pure-JAX reference (computed first, from the raw unfused params).
    ro, rh, ra = ref_forward(trg_tokens, hid, enc_outs, mask, params)

    packed = pack_decoder_params(params)                                  # once per model
    enc_b, enc_proj = precompute_attention_context(enc_outs, packed)      # once per source sequence

    # Exact-reciprocal path: tight numerical check of the restructured kernel.
    out_x, hid_x, a_x = decoder_step(trg_tokens, hid, enc_b, enc_proj, mask, packed, approx=False)
    # Default fast path: EUP approximate reciprocal in the softmax normalization.
    out, hid_new, attn = decoder_step(trg_tokens, hid, enc_b, enc_proj, mask, packed, approx=True)
    jax.block_until_ready((out, hid_new, attn, out_x, hid_x, a_x))

    np.testing.assert_allclose(np.asarray(out_x), np.asarray(ro), rtol=1e-5, atol=1e-5)
    np.testing.assert_allclose(np.asarray(hid_x), np.asarray(rh), rtol=1e-5, atol=1e-5)
    np.testing.assert_allclose(np.asarray(a_x), np.asarray(ra), rtol=1e-5, atol=1e-5)
    # approx reciprocal (~1e-4 relative error) -> looser tolerance, as noted in the perf review.
    np.testing.assert_allclose(np.asarray(out), np.asarray(ro), rtol=1e-2, atol=1e-2)
    np.testing.assert_allclose(np.asarray(hid_new), np.asarray(rh), rtol=1e-2, atol=1e-2)
    np.testing.assert_allclose(np.asarray(attn), np.asarray(ra), rtol=1e-2, atol=1e-2)

    print("KERNEL_OK")
</pallas_src>

<mosaic_0001>
module attributes {stable_mosaic.version = 11 : i64} {
  func.func @_attn_keys_kernel(%arg0: memref<2x8x32xf32, #tpu.memory_space<vmem>>, %arg1: memref<32x32xf32, #tpu.memory_space<vmem>>, %arg2: memref<1x32xf32, #tpu.memory_space<vmem>>, %arg3: memref<2x8x32xf32, #tpu.memory_space<vmem>>) attributes {dimension_semantics = [], scalar_prefetch = 0 : i64, scratch_operands = 0 : i64, tpu.core_type = #tpu.core_type<tc>} {
    %c0 = arith.constant 0 : index
    %c0_0 = arith.constant 0 : index
    %c0_1 = arith.constant 0 : index
    %0 = vector.load %arg0[%c0, %c0_0, %c0_1] : memref<2x8x32xf32, #tpu.memory_space<vmem>>, vector<2x8x32xf32>
    %1 = vector.shape_cast %0 : vector<2x8x32xf32> to vector<16x32xf32>
    %c0_2 = arith.constant 0 : index
    %c0_3 = arith.constant 0 : index
    %2 = vector.load %arg1[%c0_2, %c0_3] : memref<32x32xf32, #tpu.memory_space<vmem>>, vector<32x32xf32>
    %cst = arith.constant dense<0.000000e+00> : vector<16x32xf32>
    %3 = tpu.matmul %1, %2, %cst {dimension_numbers = #tpu.dot_dimension_numbers<[1], [0], [0], [1], [0, 0, 1, 1], [], []>} : vector<16x32xf32>, vector<32x32xf32>, vector<16x32xf32> -> vector<16x32xf32>
    %4 = vector.shape_cast %3 : vector<16x32xf32> to vector<2x8x32xf32>
    %c0_4 = arith.constant 0 : index
    %c0_5 = arith.constant 0 : index
    %5 = vector.load %arg2[%c0_4, %c0_5] : memref<1x32xf32, #tpu.memory_space<vmem>>, vector<1x32xf32>
    %6 = vector.shape_cast %5 : vector<1x32xf32> to vector<1x1x32xf32>
    %7 = vector.broadcast %6 : vector<1x1x32xf32> to vector<2x8x32xf32>
    %8 = arith.addf %4, %7 : vector<2x8x32xf32>
    %c0_6 = arith.constant 0 : index
    %c0_7 = arith.constant 0 : index
    %c0_8 = arith.constant 0 : index
    %9 = vector.load %arg3[%c0_6, %c0_7, %c0_8] : memref<2x8x32xf32, #tpu.memory_space<vmem>>, vector<2x8x32xf32>
    tpu.vector_store %arg3[%c0_6, %c0_7, %c0_8], %8 {strides = array<i32>} : memref<2x8x32xf32, #tpu.memory_space<vmem>>, vector<2x8x32xf32>,
    return
  }
}

</mosaic_0001>

<bundles_post_ra>
// kernel: tpu_custom_call.1
= control target key start
LH: loop header
LB: loop body
LE: loop exit
PB: predicated region body
PF: predicated region fallthrough
CT: control target
= control target key end

     0   :  { %8 = vsyncpa [#allocation3], 0  ;;  %s342_s0 = inlined_call_operand.hbm [shape: f32[2,8,32], index: 0, kind: input, shape index: {}]   ;;  %s343_s1 = inlined_call_operand.hbm [shape: f32[32,32], index: 1, kind: input, shape index: {}]   ;;  %s344_s2 = inlined_call_operand.vmem [shape: f32[1,32], index: 2, kind: input, shape index: {}]   ;;  %s345_s3 = inlined_call_operand.hbm [shape: f32[2,8,32], index: 3, kind: output, shape index: {}]  }
   0x1   :  { %9 = vsyncpa [#allocation6], 0 }
   0x2   :  { %10 = vsyncpa [#allocation4], 0  ;;  %s265_s12 = smov [#allocation2]   ;;  %s193_s16 = scalar_lea.hbm %s342_s0, 256 }
   0x3   :  { %s16_s13 = sshll.u32 %s265_s12, 4  ;;  %p194_p0 = scmp.ne.s32.totalorder %s342_s0, %s193_s16  ;;  %s17_s13 = int_to_ptr.vmem [resolvable:$true] %s16_s13 }
   0x4   :  { %p197_p1 = scmp.lt.u32.totalorder %s193_s16, %s342_s0 }
   0x6   :  { %p199_p2 = pnand %p197_p1, %p194_p0 }
   0x8   :  { %202 = shalt.err (!%p199_p2)
}
   0x9   :  { %s203_s21 = scalar_lea.vmem %s17_s13, 256  ;;  %p208_p4 = scmp.lt.s32.totalorder %s17_s13, %s17_s13 }
   0xa   :  { %p204_p3 = scmp.ne.s32.totalorder %s17_s13, %s203_s21  ;;  %p209_p5 = scmp.lt.s32.totalorder %s203_s21, %s203_s21 }
   0xc   :  { %p210_p6 = por %p209_p5, %p208_p4 }
   0xe   :  { %p211_p7 = pnand %p210_p6, %p204_p3 }
  0x10   :  { %214 = shalt.err (!%p211_p7)
}
  0x11   :  { %s266_s22 = smov 128   ;;  %s267_s23 = smov 8  }
  0x12   :  { %22 = dma.hbm_to_vmem [thread:$0]  %s342_s0, 256, %s17_s13, [#allocation3], %s266_s22, %s266_s22, %s267_s23  }
  0x13   :  { %s268_s26 = smov [#allocation5]   ;;  %s215_s30 = scalar_lea.hbm %s343_s1, 512 }
  0x14   :  { %s28_s27 = sshll.u32 %s268_s26, 4  ;;  %p216_p8 = scmp.ne.s32.totalorder %s343_s1, %s215_s30  ;;  %s29_s27 = int_to_ptr.vmem [resolvable:$true] %s28_s27 }
  0x15   :  { %p219_p9 = scmp.lt.u32.totalorder %s215_s30, %s343_s1 }
  0x17   :  { %p221_p10 = pnand %p219_p9, %p216_p8 }
  0x19   :  { %224 = shalt.err (!%p221_p10)
}
  0x1a   :  { %s225_s8 = scalar_lea.vmem %s29_s27, 512  ;;  %p230_p12 = scmp.lt.s32.totalorder %s29_s27, %s29_s27 }
  0x1b   :  { %p226_p11 = scmp.ne.s32.totalorder %s29_s27, %s225_s8  ;;  %p231_p13 = scmp.lt.s32.totalorder %s225_s8, %s225_s8 }
  0x1d   :  { %p232_p0 = por %p231_p13, %p230_p12 }
  0x1f   :  { %p233_p1 = pnand %p232_p0, %p226_p11 }
  0x21   :  { %236 = shalt.err (!%p233_p1)
}
  0x22   :  { %34 = dma.hbm_to_vmem [thread:$0]  %s343_s1, 512, %s29_s27, [#allocation6], %s266_s22, %s266_s22, %s267_s23  }
  0x23   :  { %259 = dma.done.wait [#allocation3], 256  }
  0x24   :  { %260 = vsyncadd [#allocation3], 4294967040 }
  0x25   :  { %261 = dma.done.wait [#allocation6], 512  }
  0x26   :  { %262 = vsyncadd [#allocation6], 4294966784  ;;  %vm49_vm0 = vcmask 261120   ;;  %v45_v0 = vld [vmem:[#allocation5] sm:$0xff]  ;;  %v46_v1 = vld [vmem:[#allocation5 + $0x8] sm:$0xff]  ;;  %s269_s11 = smov [#allocation7]  }
  0x27   :  { %v47_v2 = vld [vmem:[#allocation5 + $0x10] sm:$0xff]  ;;  %v180_v3 = vpack.c.bf16 %v46_v1, %v45_v0  ;;  %v48_v4 = vld [vmem:[#allocation5 + $0x18] sm:$0xff]  ;;  %s147_s12 = sshll.u32 %s269_s11, 4  ;;  %s148_s12 = int_to_ptr.vmem [resolvable:$true] %s147_s12 }
  0x28   :  { %v43_v5 = vld [vmem:[#allocation2] sm:$0xff]  ;;  %v184_v6 = vpack.c.bf16 %v48_v4, %v47_v2  ;;  %v44_v7 = vld [vmem:[#allocation2 + $0x8] sm:$0xff]  ;;  %s237_s13 = scalar_lea.vmem %s148_s12, 256  ;;  %p242_p3 = scmp.lt.s32.totalorder %s148_s12, %s148_s12 }
  0x29   :  { %177 = vmatprep.mubr.msk.f32.mxu0 %vm49_vm0, %v43_v5  ;;  %181 = vmatprep.subr.bf16.mxu0 %v180_v3  ;;  %v162_v8 = vld [vmem:[%s344_s2] ss:$0 sm:$0xff]  ;;  %p238_p2 = scmp.ne.s32.totalorder %s148_s12, %s237_s13  ;;  %p243_p4 = scmp.lt.s32.totalorder %s237_s13, %s237_s13 }
  0x2a   :  { %183 = vmatpush3.bf16.msra.mxu0 %v180_v3 }
  0x2b   :  { %185 = vmatprep.subr.bf16.mxu0 %v184_v6  ;;  %p244_p5 = por %p243_p4, %p242_p3 }
  0x2d   :  { %p245_p6 = pnand %p244_p5, %p238_p2 }
  0x2e   :  { %187 = vmatpush3.bf16.msra.mxu0 %v184_v6 }
  0x31   :  { %178 = vmatmul.mubr.msk.f32.vlgmr.msra.gmra.mrb[0].mxu0 %vm49_vm0, %v44_v7 }
 0x104   :  { %v179_v9 = vpop.f32.mrb[0].mxu0 }
 0x105   :  { %v139_v10 = vadd.f32 %v179_v9, %v162_v8  ;;  %v122_v11 = vpop.f32.mrb[1].mxu0 }
 0x106   :  { %v138_v12 = vadd.f32 %v162_v8, %v122_v11 }
 0x107   :  { %141 = vst.msk [vmem:[#allocation7 + $0x8] sm:$0xff] %vm49_vm0, %v139_v10 }
 0x108   :  { %140 = vst.msk [vmem:[#allocation7] sm:$0xff] %vm49_vm0, %v138_v12 }
 0x109   :  { %248 = shalt.err (!%p245_p6)
}
 0x10a   :  { %s249_s15 = scalar_lea.hbm %s345_s3, 256 }
 0x10b   :  { %p250_p7 = scmp.ne.s32.totalorder %s345_s3, %s249_s15  ;;  %p253_p8 = scmp.lt.u32.totalorder %s249_s15, %s345_s3 }
 0x10d   :  { %p255_p9 = pnand %p253_p8, %p250_p7 }
 0x10f   :  { %258 = shalt.err (!%p255_p9)
}
 0x110   :  { %153 = dma.vmem_to_hbm [thread:$0]  %s148_s12, 256, %s345_s3, [#allocation4], %s266_s22, %s266_s22, %s267_s23  }
 0x111   :  { %263 = dma.done.wait [#allocation4], 256  }
 0x112   :  { %264 = vsyncadd [#allocation4], 4294967040 }
 0x113   :  { %157 = vsyncpa [#allocation3], 1 }
 0x114   :  { %158 = vsyncpa [#allocation6], 1 }
 0x115   :  { %159 = vsyncpa [#allocation4], 1 }

</bundles_post_ra>
